<compile_context>
chip_gen: v6e
topology: v6e:2x2x1
jax: 0.10.0
libtpu: 0.0.40
codegen_flags: <defaults>
</compile_context>

<pallas_src>
import functools

import jax
import jax.numpy as jnp
from jax.experimental import pallas as pl
from jax.experimental.pallas import tpu as pltpu


def _round_up(x, m):
    return (x + m - 1) // m * m


# Below this many (padded) rows a single grid step is cheaper than splitting
# for megacore; above it we prefer >= 2 strips so v7x's two TCs both work.
_MIN_SPLIT_ROWS = 512


def _pick_strip(batch, block_rows):
    """Pick the row-strip size TB and the padded batch Bp."""
    rows = _round_up(max(batch, 1), 8)
    if rows <= block_rows:
        if rows >= 2 * _MIN_SPLIT_ROWS:
            # Big enough to split usefully across two TensorCores (v7x).
            tb = _round_up(pl.cdiv(rows, 2), 8)
        else:
            tb = rows
    else:
        tb = block_rows
    bp = _round_up(rows, tb)
    return tb, bp


# ---------------------------------------------------------------------------
# Fused MLP kernel: 4x (matmul + bias) with ReLU between and softmax at the end
# ---------------------------------------------------------------------------
def _mlp_kernel(x_ref,
                w1_ref, b1_ref,
                w2_ref, b2_ref,
                w3_ref, b3_ref,
                w4_ref, b4_ref,
                o_ref):
    # x / weights may be bf16; accumulation and all VPU/EUP math stay f32.
    h = jnp.dot(x_ref[...], w1_ref[...],
                preferred_element_type=jnp.float32)            # (TB, 256)
    h = jnp.maximum(h + b1_ref[...], 0.0)

    h = jnp.dot(h.astype(w2_ref.dtype), w2_ref[...],
                preferred_element_type=jnp.float32)            # (TB, 128)
    h = jnp.maximum(h + b2_ref[...], 0.0)

    h = jnp.dot(h.astype(w3_ref.dtype), w3_ref[...],
                preferred_element_type=jnp.float32)            # (TB, 64)
    h = jnp.maximum(h + b3_ref[...], 0.0)

    logits = jnp.dot(h.astype(w4_ref.dtype), w4_ref[...],
                     preferred_element_type=jnp.float32) + b4_ref[...]  # (TB, Npad)
    # Padded output lanes carry bias = -1e30 (and zero weight columns), so
    # they contribute exp(-1e30 - m) == 0 to the row softmax.

    # Numerically-stable softmax over the last dim.
    m = jnp.max(logits, axis=-1, keepdims=True)
    e = jnp.exp(logits - m)
    denom = jnp.sum(e, axis=-1, keepdims=True)
    inv = pl.reciprocal(denom, approx=False)   # EUP slot; exact for parity
    o_ref[...] = (e * inv).astype(o_ref.dtype)


# ---------------------------------------------------------------------------
# Wrapper
# ---------------------------------------------------------------------------
@functools.partial(jax.jit, static_argnames=("block_rows", "matmul_dtype"))
def mlp_forward(x, params, *, block_rows=1024, matmul_dtype=jnp.bfloat16):
    """Fused MLP forward.

    params hold weights laid out as (in, out) (i.e. PyTorch nn.Linear weight
    transposed) and biases as (out,).  `matmul_dtype` controls the streaming /
    MXU operand dtype (None or jnp.float32 keeps the exact f32 path); bias-add,
    ReLU and softmax are always computed in f32.
    """
    B, Din = x.shape
    out_dtype = x.dtype

    w1, b1 = params["w1"], params["b1"]
    w2, b2 = params["w2"], params["b2"]
    w3, b3 = params["w3"], params["b3"]
    w4, b4 = params["w4"], params["b4"]
    H1, H2, H3, Dout = w1.shape[1], w2.shape[1], w3.shape[1], w4.shape[1]

    # --- lane-dense output: pad last layer to a multiple of 128 lanes -------
    Npad = _round_up(Dout, 128)
    if Npad != Dout:
        w4 = jnp.pad(w4, ((0, 0), (0, Npad - Dout)))           # zero columns
        b4 = jnp.concatenate(
            [b4.astype(jnp.float32),
             jnp.full((Npad - Dout,), -1e30, jnp.float32)])    # mask padded logits

    # --- optional bf16 streaming of x / weights (cast once, not per step) ---
    if matmul_dtype is not None and jnp.dtype(matmul_dtype) != jnp.dtype(x.dtype):
        x = x.astype(matmul_dtype)
        w1 = w1.astype(matmul_dtype)
        w2 = w2.astype(matmul_dtype)
        w3 = w3.astype(matmul_dtype)
        w4 = w4.astype(matmul_dtype)

    # Biases as f32 (1, H) rows so they broadcast over the batch strip.
    b1r = b1.astype(jnp.float32).reshape(1, H1)
    b2r = b2.astype(jnp.float32).reshape(1, H2)
    b3r = b3.astype(jnp.float32).reshape(1, H3)
    b4r = b4.astype(jnp.float32).reshape(1, Npad)

    # --- batch strip selection (amortize per-step overhead; >=2 steps when
    #     the batch is big enough so v7x megacore gets both TCs busy) --------
    TB, Bp = _pick_strip(B, block_rows)
    if Bp != B:
        x = jnp.pad(x, ((0, Bp - B), (0, 0)))

    grid = (Bp // TB,)
    const = lambda i: (0, 0)   # weights/biases resident across all grid steps

    out = pl.pallas_call(
        _mlp_kernel,
        out_shape=jax.ShapeDtypeStruct((Bp, Npad), out_dtype),
        grid=grid,
        in_specs=[
            pl.BlockSpec((TB, Din), lambda i: (i, 0)),   # x row strip
            pl.BlockSpec((Din, H1), const),              # W1
            pl.BlockSpec((1, H1), const),                # b1
            pl.BlockSpec((H1, H2), const),               # W2
            pl.BlockSpec((1, H2), const),                # b2
            pl.BlockSpec((H2, H3), const),               # W3
            pl.BlockSpec((1, H3), const),                # b3
            pl.BlockSpec((H3, Npad), const),             # W4 (lane-padded)
            pl.BlockSpec((1, Npad), const),              # b4 (lane-padded)
        ],
        out_specs=pl.BlockSpec((TB, Npad), lambda i: (i, 0)),   # lane-dense store
        compiler_params=pltpu.CompilerParams(
            dimension_semantics=("parallel",)),
    )(x, w1, b1r, w2, b2r, w3, b3r, w4, b4r)

    return out[:B, :Dout]


# ---------------------------------------------------------------------------
# Pure-JAX reference (independent check)
# ---------------------------------------------------------------------------
def _reference(x, params):
    h = jnp.maximum(x @ params["w1"] + params["b1"], 0.0)
    h = jnp.maximum(h @ params["w2"] + params["b2"], 0.0)
    h = jnp.maximum(h @ params["w3"] + params["b3"], 0.0)
    logits = h @ params["w4"] + params["b4"]
    return jax.nn.softmax(logits, axis=-1)


# ---------------------------------------------------------------------------
# Demo
# ---------------------------------------------------------------------------
if __name__ == "__main__":
    # Small shapes implied by the module: batch=2, in_size=32, out_size=16,
    # hidden widths fixed by the module (256, 128, 64).
    B, DIN, DOUT = 2, 32, 16
    H1, H2, H3 = 256, 128, 64

    key = jax.random.PRNGKey(0)
    ks = jax.random.split(key, 9)
    x = jax.random.normal(ks[0], (B, DIN), jnp.float32)

    def lin(kw, kb, din, dout):
        # weights stored as (in, out) == PyTorch nn.Linear weight transposed
        w = jax.random.normal(kw, (din, dout), jnp.float32) * (1.0 / jnp.sqrt(din))
        b = jax.random.normal(kb, (dout,), jnp.float32) * 0.1
        return w, b

    w1, b1 = lin(ks[1], ks[2], DIN, H1)
    w2, b2 = lin(ks[3], ks[4], H1, H2)
    w3, b3 = lin(ks[5], ks[6], H2, H3)
    w4, b4 = lin(ks[7], ks[8], H3, DOUT)

    params = {"w1": w1, "b1": b1, "w2": w2, "b2": b2,
              "w3": w3, "b3": b3, "w4": w4, "b4": b4}

    ref = jax.block_until_ready(_reference(x, params))

    # 1) Exact-parity path (f32 streaming) -- strict tolerance.
    out_f32 = jax.block_until_ready(
        mlp_forward(x, params, matmul_dtype=jnp.float32))
    assert out_f32.shape == (B, DOUT), out_f32.shape
    assert jnp.allclose(out_f32, ref, atol=1e-5, rtol=1e-5), \
        float(jnp.max(jnp.abs(out_f32 - ref)))
    assert jnp.allclose(jnp.sum(out_f32, axis=-1), 1.0, atol=1e-5)

    # 2) Performance path (bf16 streaming, f32 accumulation) -- loose tolerance.
    out_bf16 = jax.block_until_ready(
        mlp_forward(x, params, matmul_dtype=jnp.bfloat16))
    assert out_bf16.shape == (B, DOUT), out_bf16.shape
    assert jnp.allclose(out_bf16, ref, atol=3e-2, rtol=3e-2), \
        float(jnp.max(jnp.abs(out_bf16 - ref)))
    assert jnp.allclose(jnp.sum(out_bf16, axis=-1), 1.0, atol=1e-3)

    # 3) Multi-strip / batch-padding path (grid > 1) -- exercises tiling.
    xb = jax.random.normal(ks[0], (137, DIN), jnp.float32)
    out_big = jax.block_until_ready(
        mlp_forward(xb, params, block_rows=64, matmul_dtype=jnp.float32))
    ref_big = _reference(xb, params)
    assert out_big.shape == (137, DOUT)
    assert jnp.allclose(out_big, ref_big, atol=1e-5, rtol=1e-5), \
        float(jnp.max(jnp.abs(out_big - ref_big)))

    print("KERNEL_OK")
</pallas_src>

<mosaic_0001>
module attributes {stable_mosaic.version = 11 : i64} {
  func.func @_mlp_kernel(%arg0: i32, %arg1: memref<8x32xf32, #tpu.memory_space<vmem>>, %arg2: memref<32x256xf32, #tpu.memory_space<vmem>>, %arg3: memref<1x256xf32, #tpu.memory_space<vmem>>, %arg4: memref<256x128xf32, #tpu.memory_space<vmem>>, %arg5: memref<1x128xf32, #tpu.memory_space<vmem>>, %arg6: memref<128x64xf32, #tpu.memory_space<vmem>>, %arg7: memref<1x64xf32, #tpu.memory_space<vmem>>, %arg8: memref<64x128xf32, #tpu.memory_space<vmem>>, %arg9: memref<1x128xf32, #tpu.memory_space<vmem>>, %arg10: memref<8x128xf32, #tpu.memory_space<vmem>>) attributes {dimension_semantics = [#tpu.dimension_semantics<parallel>], iteration_bounds = array<i64: 1>, scalar_prefetch = 0 : i64, scratch_operands = 0 : i64, tpu.core_type = #tpu.core_type<tc>, window_params = [{transform_indices = @transform_0, window_bounds = array<i64: 8, 32>}, {pipeline_mode = #tpu.pipeline_mode<synchronous>, transform_indices = @transform_1, window_bounds = array<i64: 32, 256>}, {pipeline_mode = #tpu.pipeline_mode<synchronous>, transform_indices = @transform_2, window_bounds = array<i64: 1, 256>}, {pipeline_mode = #tpu.pipeline_mode<synchronous>, transform_indices = @transform_3, window_bounds = array<i64: 256, 128>}, {pipeline_mode = #tpu.pipeline_mode<synchronous>, transform_indices = @transform_4, window_bounds = array<i64: 1, 128>}, {pipeline_mode = #tpu.pipeline_mode<synchronous>, transform_indices = @transform_5, window_bounds = array<i64: 128, 64>}, {pipeline_mode = #tpu.pipeline_mode<synchronous>, transform_indices = @transform_6, window_bounds = array<i64: 1, 64>}, {pipeline_mode = #tpu.pipeline_mode<synchronous>, transform_indices = @transform_7, window_bounds = array<i64: 64, 128>}, {pipeline_mode = #tpu.pipeline_mode<synchronous>, transform_indices = @transform_8, window_bounds = array<i64: 1, 128>}, {transform_indices = @transform_9, window_bounds = array<i64: 8, 128>}]} {
    %c0 = arith.constant 0 : index
    %c0_0 = arith.constant 0 : index
    %0 = vector.load %arg1[%c0, %c0_0] : memref<8x32xf32, #tpu.memory_space<vmem>>, vector<8x32xf32>
    %c0_1 = arith.constant 0 : index
    %c0_2 = arith.constant 0 : index
    %1 = vector.load %arg2[%c0_1, %c0_2] : memref<32x256xf32, #tpu.memory_space<vmem>>, vector<32x256xf32>
    %cst = arith.constant dense<0.000000e+00> : vector<8x256xf32>
    %2 = tpu.matmul %0, %1, %cst {dimension_numbers = #tpu.dot_dimension_numbers<[1], [0], [0], [1], [0, 0, 1, 1], [], []>} : vector<8x32xf32>, vector<32x256xf32>, vector<8x256xf32> -> vector<8x256xf32>
    %c0_3 = arith.constant 0 : index
    %c0_4 = arith.constant 0 : index
    %3 = vector.load %arg3[%c0_3, %c0_4] : memref<1x256xf32, #tpu.memory_space<vmem>>, vector<1x256xf32>
    %4 = vector.broadcast %3 : vector<1x256xf32> to vector<8x256xf32>
    %5 = arith.addf %2, %4 : vector<8x256xf32>
    %cst_5 = arith.constant 0.000000e+00 : f32
    %6 = vector.broadcast %cst_5 : f32 to vector<8x256xf32>
    %7 = arith.maximumf %5, %6 : vector<8x256xf32>
    %c0_6 = arith.constant 0 : index
    %c0_7 = arith.constant 0 : index
    %8 = vector.load %arg4[%c0_6, %c0_7] : memref<256x128xf32, #tpu.memory_space<vmem>>, vector<256x128xf32>
    %cst_8 = arith.constant dense<0.000000e+00> : vector<8x128xf32>
    %9 = tpu.matmul %7, %8, %cst_8 {dimension_numbers = #tpu.dot_dimension_numbers<[1], [0], [0], [1], [0, 0, 1, 1], [], []>} : vector<8x256xf32>, vector<256x128xf32>, vector<8x128xf32> -> vector<8x128xf32>
    %c0_9 = arith.constant 0 : index
    %c0_10 = arith.constant 0 : index
    %10 = vector.load %arg5[%c0_9, %c0_10] : memref<1x128xf32, #tpu.memory_space<vmem>>, vector<1x128xf32>
    %11 = vector.broadcast %10 : vector<1x128xf32> to vector<8x128xf32>
    %12 = arith.addf %9, %11 : vector<8x128xf32>
    %cst_11 = arith.constant 0.000000e+00 : f32
    %13 = vector.broadcast %cst_11 : f32 to vector<8x128xf32>
    %14 = arith.maximumf %12, %13 : vector<8x128xf32>
    %c0_12 = arith.constant 0 : index
    %c0_13 = arith.constant 0 : index
    %15 = vector.load %arg6[%c0_12, %c0_13] : memref<128x64xf32, #tpu.memory_space<vmem>>, vector<128x64xf32>
    %cst_14 = arith.constant dense<0.000000e+00> : vector<8x64xf32>
    %16 = tpu.matmul %14, %15, %cst_14 {dimension_numbers = #tpu.dot_dimension_numbers<[1], [0], [0], [1], [0, 0, 1, 1], [], []>} : vector<8x128xf32>, vector<128x64xf32>, vector<8x64xf32> -> vector<8x64xf32>
    %c0_15 = arith.constant 0 : index
    %c0_16 = arith.constant 0 : index
    %17 = vector.load %arg7[%c0_15, %c0_16] : memref<1x64xf32, #tpu.memory_space<vmem>>, vector<1x64xf32>
    %18 = vector.broadcast %17 : vector<1x64xf32> to vector<8x64xf32>
    %19 = arith.addf %16, %18 : vector<8x64xf32>
    %cst_17 = arith.constant 0.000000e+00 : f32
    %20 = vector.broadcast %cst_17 : f32 to vector<8x64xf32>
    %21 = arith.maximumf %19, %20 : vector<8x64xf32>
    %c0_18 = arith.constant 0 : index
    %c0_19 = arith.constant 0 : index
    %22 = vector.load %arg8[%c0_18, %c0_19] : memref<64x128xf32, #tpu.memory_space<vmem>>, vector<64x128xf32>
    %cst_20 = arith.constant dense<0.000000e+00> : vector<8x128xf32>
    %23 = tpu.matmul %21, %22, %cst_20 {dimension_numbers = #tpu.dot_dimension_numbers<[1], [0], [0], [1], [0, 0, 1, 1], [], []>} : vector<8x64xf32>, vector<64x128xf32>, vector<8x128xf32> -> vector<8x128xf32>
    %c0_21 = arith.constant 0 : index
    %c0_22 = arith.constant 0 : index
    %24 = vector.load %arg9[%c0_21, %c0_22] : memref<1x128xf32, #tpu.memory_space<vmem>>, vector<1x128xf32>
    %25 = vector.broadcast %24 : vector<1x128xf32> to vector<8x128xf32>
    %26 = arith.addf %23, %25 : vector<8x128xf32>
    %cst_23 = arith.constant dense<0xFF800000> : vector<8xf32>
    %27 = vector.multi_reduction <maximumf>, %26, %cst_23 [1] : vector<8x128xf32> to vector<8xf32>
    %28 = vector.shape_cast %27 : vector<8xf32> to vector<8x1xf32>
    %29 = vector.broadcast %28 : vector<8x1xf32> to vector<8x128xf32>
    %30 = arith.subf %26, %29 : vector<8x128xf32>
    %31 = math.exp %30 : vector<8x128xf32>
    %cst_24 = arith.constant dense<0.000000e+00> : vector<8xf32>
    %32 = vector.multi_reduction <add>, %31, %cst_24 [1] : vector<8x128xf32> to vector<8xf32>
    %33 = vector.shape_cast %32 : vector<8xf32> to vector<8x1xf32>
    %34 = tpu.reciprocal %33 : vector<8x1xf32> -> vector<8x1xf32>
    %35 = vector.broadcast %34 : vector<8x1xf32> to vector<8x128xf32>
    %36 = arith.mulf %31, %35 : vector<8x128xf32>
    %c0_25 = arith.constant 0 : index
    %c0_26 = arith.constant 0 : index
    %37 = vector.load %arg10[%c0_25, %c0_26] : memref<8x128xf32, #tpu.memory_space<vmem>>, vector<8x128xf32>
    tpu.vector_store %arg10[%c0_25, %c0_26], %36 {strides = array<i32>} : memref<8x128xf32, #tpu.memory_space<vmem>>, vector<8x128xf32>,
    return
  }
  func.func @transform_0(%arg0: i32) -> (i32, i32) {
    %c0_i32 = arith.constant 0 : i32
    %c0_i32_0 = arith.constant 0 : i32
    return %arg0, %c0_i32 : i32, i32
  }
  func.func @transform_1(%arg0: i32) -> (i32, i32) {
    %c0_i32 = arith.constant 0 : i32
    %c0_i32_0 = arith.constant 0 : i32
    %c0_i32_1 = arith.constant 0 : i32
    return %c0_i32, %c0_i32_0 : i32, i32
  }
  func.func @transform_2(%arg0: i32) -> (i32, i32) {
    %c0_i32 = arith.constant 0 : i32
    %c0_i32_0 = arith.constant 0 : i32
    %c0_i32_1 = arith.constant 0 : i32
    return %c0_i32, %c0_i32_0 : i32, i32
  }
  func.func @transform_3(%arg0: i32) -> (i32, i32) {
    %c0_i32 = arith.constant 0 : i32
    %c0_i32_0 = arith.constant 0 : i32
    %c0_i32_1 = arith.constant 0 : i32
    return %c0_i32, %c0_i32_0 : i32, i32
  }
  func.func @transform_4(%arg0: i32) -> (i32, i32) {
    %c0_i32 = arith.constant 0 : i32
    %c0_i32_0 = arith.constant 0 : i32
    %c0_i32_1 = arith.constant 0 : i32
    return %c0_i32, %c0_i32_0 : i32, i32
  }
  func.func @transform_5(%arg0: i32) -> (i32, i32) {
    %c0_i32 = arith.constant 0 : i32
    %c0_i32_0 = arith.constant 0 : i32
    %c0_i32_1 = arith.constant 0 : i32
    return %c0_i32, %c0_i32_0 : i32, i32
  }
  func.func @transform_6(%arg0: i32) -> (i32, i32) {
    %c0_i32 = arith.constant 0 : i32
    %c0_i32_0 = arith.constant 0 : i32
    %c0_i32_1 = arith.constant 0 : i32
    return %c0_i32, %c0_i32_0 : i32, i32
  }
  func.func @transform_7(%arg0: i32) -> (i32, i32) {
    %c0_i32 = arith.constant 0 : i32
    %c0_i32_0 = arith.constant 0 : i32
    %c0_i32_1 = arith.constant 0 : i32
    return %c0_i32, %c0_i32_0 : i32, i32
  }
  func.func @transform_8(%arg0: i32) -> (i32, i32) {
    %c0_i32 = arith.constant 0 : i32
    %c0_i32_0 = arith.constant 0 : i32
    %c0_i32_1 = arith.constant 0 : i32
    return %c0_i32, %c0_i32_0 : i32, i32
  }
  func.func @transform_9(%arg0: i32) -> (i32, i32) {
    %c0_i32 = arith.constant 0 : i32
    %c0_i32_0 = arith.constant 0 : i32
    return %arg0, %c0_i32 : i32, i32
  }
}

</mosaic_0001>

<bundles_post_ra>
// kernel: mlp_forward.1
= control target key start
LH: loop header
LB: loop body
LE: loop exit
PB: predicated region body
PF: predicated region fallthrough
CT: control target
= control target key end

     0   :  { %v563_v3 = vmov 0.0   ;;  %vm53_vm0 = vcmask 261120   ;;  %v43_v53 = vlaneseq  ;;  %vm564_vm1 = vmmov 0   ;;  %s852_s1 = inlined_call_operand.vmem [shape: f32[32,256], index: 1, kind: input, shape index: {}]   ;;  %s853_s3 = inlined_call_operand.vmem [shape: f32[256,128], index: 3, kind: input, shape index: {}]   ;;  %s854_s0 = inlined_call_operand.vmem [shape: f32[8,32], index: 0, kind: input, shape index: {}]   ;;  %s855_s5 = inlined_call_operand.vmem [shape: f32[128,64], index: 5, kind: input, shape index: {}]   ;;  %s856_s2 = inlined_call_operand.vmem [shape: f32[1,256], index: 2, kind: input, shape index: {}]   ;;  %s857_s7 = inlined_call_operand.vmem [shape: f32[64,128], index: 7, kind: input, shape index: {}]   ;;  %s858_s4 = inlined_call_operand.vmem [shape: f32[1,128], index: 4, kind: input, shape index: {}]   ;;  %s859_s6 = inlined_call_operand.vmem [shape: f32[1,64], index: 6, kind: input, shape index: {}]   ;;  %s860_s8 = inlined_call_operand.vmem [shape: f32[1,128], index: 8, kind: input, shape index: {}]   ;;  %s861_s9 = inlined_call_operand.vmem [shape: f32[8,128], index: 9, kind: output, shape index: {}]  }
   0x1   :  { %v40_v0 = vld [vmem:[%s852_s1 + $0x38] sm:$0xff]  ;;  %v39_v1 = vld [vmem:[%s852_s1 + $0x30] sm:$0xff]  ;;  %v38_v2 = vld [vmem:[%s852_s1 + $0x28] sm:$0xff]  ;;  %121 = vmatprep.mubr.f32.mxu0 %v563_v3  ;;  %vm349_vm2 = vcmask 523264  }
   0x2   :  { %81 = vmatprep.subr.mxu0 %v40_v0  ;;  %v37_v4 = vld [vmem:[%s852_s1 + $0x20] sm:$0xff]  ;;  %v36_v5 = vld [vmem:[%s852_s1 + $0x18] sm:$0xff]  ;;  %v35_v6 = vld [vmem:[%s852_s1 + $0x10] sm:$0xff]  ;;  %v44_v54 = vshrl.u32 %v43_v53, 7 }
   0x3   :  { %82 = vmatpush1.msra.mxu0 %v39_v1  ;;  %v161_v7 = vld [vmem:[%s853_s3 + $0xf8] sm:$0xff]  ;;  %v160_v9 = vld [vmem:[%s853_s3 + $0xf0] sm:$0xff]  ;;  %v34_v10 = vld [vmem:[%s852_s1 + $0x8] sm:$0xff] }
   0x4   :  { %83 = vmatprep.subr.mxu0 %v38_v2  ;;  %v145_v8 = vld [vmem:[%s853_s3 + $0x78] sm:$0xff]  ;;  %442 = vmatprep.subr.mxu1 %v161_v7  ;;  %v144_v11 = vld [vmem:[%s853_s3 + $0x70] sm:$0xff]  ;;  %v33_v12 = vld [vmem:[%s852_s1] sm:$0xff]  ;;  %v45_v55 = vsub.s32 0, %v44_v54  ;;  %v49_v57 = vsub.s32 1, %v44_v54 }
   0x5   :  { %84 = vmatpush1.msra.mxu0 %v37_v4  ;;  %443 = vmatpush3.msra.mxu1 %v145_v8  ;;  %v159_v13 = vld [vmem:[%s853_s3 + $0xe8] sm:$0xff]  ;;  %v32_v14 = vld [vmem:[%s854_s0] sm:$0xff]  ;;  %v157_v18 = vld [vmem:[%s853_s3 + $0xd8] sm:$0xff] }
   0x6   :  { %85 = vmatprep.subr.mxu0 %v36_v5  ;;  %444 = vmatprep.subr.mxu1 %v160_v9  ;;  %v143_v15 = vld [vmem:[%s853_s3 + $0x68] sm:$0xff]  ;;  %v158_v16 = vld [vmem:[%s853_s3 + $0xe0] sm:$0xff]  ;;  %v141_v19 = vld [vmem:[%s853_s3 + $0x58] sm:$0xff] }
   0x7   :  { %86 = vmatpush1.msra.mxu0 %v35_v6  ;;  %445 = vmatpush3.msra.mxu1 %v144_v11  ;;  %v142_v17 = vld [vmem:[%s853_s3 + $0x60] sm:$0xff]  ;;  %v156_v20 = vld [vmem:[%s853_s3 + $0xd0] sm:$0xff]  ;;  %v155_v22 = vld [vmem:[%s853_s3 + $0xc8] sm:$0xff] }
   0x8   :  { %87 = vmatprep.subr.mxu0 %v34_v10  ;;  %446 = vmatprep.subr.mxu1 %v159_v13  ;;  %v140_v21 = vld [vmem:[%s853_s3 + $0x50] sm:$0xff]  ;;  %v139_v23 = vld [vmem:[%s853_s3 + $0x48] sm:$0xff]  ;;  %v154_v24 = vld [vmem:[%s853_s3 + $0xc0] sm:$0xff] }
   0x9   :  { %88 = vmatpush1.msra.mxu0 %v33_v12  ;;  %447 = vmatpush3.msra.mxu1 %v143_v15  ;;  %v138_v25 = vld [vmem:[%s853_s3 + $0x40] sm:$0xff]  ;;  %v153_v26 = vld [vmem:[%s853_s3 + $0xb8] sm:$0xff]  ;;  %v152_v28 = vld [vmem:[%s853_s3 + $0xb0] sm:$0xff] }
   0xa   :  { %437 = vmatmul.mubr.msk.f32.vlgmr.msra.gmra.mxu0 %vm53_vm0, %v32_v14  ;;  %448 = vmatprep.subr.mxu1 %v158_v16  ;;  %v137_v27 = vld [vmem:[%s853_s3 + $0x38] sm:$0xff]  ;;  %v136_v29 = vld [vmem:[%s853_s3 + $0x30] sm:$0xff]  ;;  %v151_v30 = vld [vmem:[%s853_s3 + $0xa8] sm:$0xff] }
   0xb   :  { %503 = vmatprep.subr.mxu0 %v563_v3  ;;  %449 = vmatpush3.msra.mxu1 %v142_v17  ;;  %v135_v31 = vld [vmem:[%s853_s3 + $0x28] sm:$0xff]  ;;  %v150_v32 = vld [vmem:[%s853_s3 + $0xa0] sm:$0xff]  ;;  %v149_v34 = vld [vmem:[%s853_s3 + $0x98] sm:$0xff] }
   0xc   :  { %450 = vmatprep.subr.mxu1 %v157_v18  ;;  %v134_v33 = vld [vmem:[%s853_s3 + $0x20] sm:$0xff]  ;;  %v133_v35 = vld [vmem:[%s853_s3 + $0x18] sm:$0xff]  ;;  %v148_v36 = vld [vmem:[%s853_s3 + $0x90] sm:$0xff]  ;;  %535 = vmatprep.mubr.msk.f32.mxu0 %vm564_vm1, %v563_v3 }
   0xd   :  { %451 = vmatpush3.msra.mxu1 %v141_v19  ;;  %v132_v37 = vld [vmem:[%s853_s3 + $0x10] sm:$0xff]  ;;  %v147_v38 = vld [vmem:[%s853_s3 + $0x88] sm:$0xff]  ;;  %v146_v40 = vld [vmem:[%s853_s3 + $0x80] sm:$0xff] }
   0xe   :  { %452 = vmatprep.subr.mxu1 %v156_v20  ;;  %v131_v39 = vld [vmem:[%s853_s3 + $0x8] sm:$0xff]  ;;  %v130_v41 = vld [vmem:[%s853_s3] sm:$0xff]  ;;  %v255_v42 = vld [vmem:[%s855_s5 + $0x78] sm:$0xff] }
   0xf   :  { %453 = vmatpush3.msra.mxu1 %v140_v21  ;;  %v254_v43 = vld [vmem:[%s855_s5 + $0x70] sm:$0xff]  ;;  %504 = vmatpush3.msra.mxu0 %v255_v42  ;;  %v253_v44 = vld [vmem:[%s855_s5 + $0x68] sm:$0xff]  ;;  %v252_v45 = vld [vmem:[%s855_s5 + $0x60] sm:$0xff] }
  0x10   :  { %454 = vmatprep.subr.mxu1 %v155_v22  ;;  %505 = vmatprep.subr.mxu0 %v563_v3  ;;  %v251_v46 = vld [vmem:[%s855_s5 + $0x58] sm:$0xff]  ;;  %v250_v47 = vld [vmem:[%s855_s5 + $0x50] sm:$0xff]  ;;  %v249_v48 = vld [vmem:[%s855_s5 + $0x48] sm:$0xff] }
  0x11   :  { %455 = vmatpush3.msra.mxu1 %v139_v23  ;;  %506 = vmatpush3.msra.mxu0 %v254_v43  ;;  %v248_v49 = vld [vmem:[%s855_s5 + $0x40] sm:$0xff]  ;;  %v247_v50 = vld [vmem:[%s855_s5 + $0x38] sm:$0xff]  ;;  %v246_v51 = vld [vmem:[%s855_s5 + $0x30] sm:$0xff] }
  0x12   :  { %456 = vmatprep.subr.mxu1 %v154_v24  ;;  %507 = vmatprep.subr.mxu0 %v563_v3  ;;  %v245_v52 = vld [vmem:[%s855_s5 + $0x28] sm:$0xff]  ;;  %v41_v56 = vld [vmem:[%s856_s2] sm:$0x3]  ;;  %v243_v4 = vld [vmem:[%s855_s5 + $0x18] sm:$0xff] }
  0x13   :  { %457 = vmatpush3.msra.mxu1 %v138_v25  ;;  %508 = vmatpush3.msra.mxu0 %v253_v44  ;;  %v46_v58 = vrot.slane %v41_v56, %v45_v55  ;;  %v50_v59 = vrot.slane %v41_v56, %v49_v57  ;;  %v244_v2 = vld [vmem:[%s855_s5 + $0x20] sm:$0xff]  ;;  %v242_v5 = vld [vmem:[%s855_s5 + $0x10] sm:$0xff]  ;;  %v241_v6 = vld [vmem:[%s855_s5 + $0x8] sm:$0xff] }
  0x14   :  { %458 = vmatprep.subr.mxu1 %v153_v26  ;;  %509 = vmatprep.subr.mxu0 %v563_v3  ;;  %v240_v7 = vld [vmem:[%s855_s5] sm:$0xff]  ;;  %v341_v8 = vld [vmem:[%s857_s7 + $0x38] sm:$0xff]  ;;  %v340_v9 = vld [vmem:[%s857_s7 + $0x30] sm:$0xff] }
  0x15   :  { %459 = vmatpush3.msra.mxu1 %v137_v27  ;;  %510 = vmatpush3.msra.mxu0 %v252_v45  ;;  %v339_v10 = vld [vmem:[%s857_s7 + $0x28] sm:$0xff]  ;;  %v338_v11 = vld [vmem:[%s857_s7 + $0x20] sm:$0xff]  ;;  %v337_v12 = vld [vmem:[%s857_s7 + $0x18] sm:$0xff] }
  0x16   :  { %460 = vmatprep.subr.mxu1 %v152_v28  ;;  %511 = vmatprep.subr.mxu0 %v563_v3  ;;  %v438_v14 = vld [vmem:[%s858_s4] ss:$0 sm:$0xff]  ;;  %v336_v19 = vld [vmem:[%s857_s7 + $0x10] sm:$0xff]  ;;  %v335_v20 = vld [vmem:[%s857_s7 + $0x8] sm:$0xff] }
  0x17   :  { %461 = vmatpush3.msra.mxu1 %v136_v29  ;;  %512 = vmatpush3.msra.mxu0 %v251_v46  ;;  %v334_v21 = vld [vmem:[%s857_s7] sm:$0xff] }
  0x18   :  { %462 = vmatprep.subr.mxu1 %v151_v30  ;;  %513 = vmatprep.subr.mxu0 %v563_v3  ;;  %v439_v22 = vld [vmem:[%s859_s6] ss:$0 sm:$0xff] }
  0x19   :  { %463 = vmatpush3.msra.mxu1 %v135_v31  ;;  %514 = vmatpush3.msra.mxu0 %v250_v47  ;;  %v440_v27 = vld [vmem:[%s860_s8] ss:$0 sm:$0xff] }
  0x1a   :  { %464 = vmatprep.subr.mxu1 %v150_v32  ;;  %515 = vmatprep.subr.mxu0 %v563_v3 }
  0x1b   :  { %465 = vmatpush3.msra.mxu1 %v134_v33  ;;  %516 = vmatpush3.msra.mxu0 %v249_v48 }
  0x1c   :  { %466 = vmatprep.subr.mxu1 %v149_v34  ;;  %517 = vmatprep.subr.mxu0 %v563_v3 }
  0x1d   :  { %467 = vmatpush3.msra.mxu1 %v133_v35  ;;  %518 = vmatpush3.msra.mxu0 %v248_v49 }
  0x1e   :  { %468 = vmatprep.subr.mxu1 %v148_v36  ;;  %519 = vmatprep.subr.mxu0 %v563_v3 }
  0x1f   :  { %469 = vmatpush3.msra.mxu1 %v132_v37  ;;  %520 = vmatpush3.msra.mxu0 %v247_v50 }
  0x20   :  { %470 = vmatprep.subr.mxu1 %v147_v38  ;;  %521 = vmatprep.subr.mxu0 %v563_v3 }
  0x21   :  { %471 = vmatpush3.msra.mxu1 %v131_v39  ;;  %522 = vmatpush3.msra.mxu0 %v246_v51 }
  0x22   :  { %472 = vmatprep.subr.mxu1 %v146_v40  ;;  %523 = vmatprep.subr.mxu0 %v563_v3 }
  0x23   :  { %473 = vmatpush3.msra.mxu1 %v130_v41  ;;  %524 = vmatpush3.msra.mxu0 %v245_v52 }
  0x24   :  { %538 = vmatprep.subr.mxu1 %v563_v3  ;;  %525 = vmatprep.subr.mxu0 %v563_v3 }
  0x25   :  { %526 = vmatpush3.msra.mxu0 %v244_v2 }
  0x26   :  { %527 = vmatprep.subr.mxu0 %v563_v3 }
  0x27   :  { %528 = vmatpush3.msra.mxu0 %v243_v4 }
  0x28   :  { %529 = vmatprep.subr.mxu0 %v563_v3 }
  0x29   :  { %530 = vmatpush3.msra.mxu0 %v242_v5 }
  0x2a   :  { %531 = vmatprep.subr.mxu0 %v563_v3 }
  0x2b   :  { %532 = vmatpush3.msra.mxu0 %v241_v6 }
  0x2c   :  { %533 = vmatprep.subr.mxu0 %v563_v3 }
  0x2d   :  { %534 = vmatpush3.msra.mxu0 %v240_v7 }
  0xca   :  { %v123_v60 = vpop.f32.mrf.mxu0 }
  0xcb   :  { %v124_v61 = vadd.f32 %v123_v60, %v46_v58 }
  0xcc   :  { %v125_v62 = vpop.f32.mrf.mxu0 }
  0xcd   :  { %v126_v63 = vadd.f32 %v125_v62, %v50_v59  ;;  %v128_v1 = vmax.f32 %v124_v61, 0.0 }
  0xcf   :  { %v129_v0 = vmax.f32 %v126_v63, 0.0 }
  0xd1   :  { %233 = vmatprep.mubr.f32.mxu1 %v129_v0 }
  0xd2   :  { %234 = vmatmul.mubr.f32.vlgmr.msra.gmra.mxu1 %v128_v1 }
  0xd3   :  { %554 = vmatprep.mubr.msk.f32.mxu1 %vm564_vm1, %v563_v3  ;;  %539 = vmatpush3.msra.mxu1 %v341_v8 }
  0xd4   :  { %540 = vmatprep.subr.mxu1 %v563_v3 }
  0xd5   :  { %541 = vmatpush3.msra.mxu1 %v340_v9 }
  0xd6   :  { %542 = vmatprep.subr.mxu1 %v563_v3 }
  0xd7   :  { %543 = vmatpush3.msra.mxu1 %v339_v10 }
  0xd8   :  { %544 = vmatprep.subr.mxu1 %v563_v3 }
  0xd9   :  { %545 = vmatpush3.msra.mxu1 %v338_v11 }
  0xda   :  { %546 = vmatprep.subr.mxu1 %v563_v3 }
  0xdb   :  { %547 = vmatpush3.msra.mxu1 %v337_v12 }
  0xdc   :  { %548 = vmatprep.subr.mxu1 %v563_v3 }
  0xdd   :  { %549 = vmatpush3.msra.mxu1 %v336_v19 }
  0xde   :  { %550 = vmatprep.subr.mxu1 %v563_v3 }
  0xdf   :  { %551 = vmatpush3.msra.mxu1 %v335_v20 }
  0xe0   :  { %552 = vmatprep.subr.mxu1 %v563_v3 }
  0xe1   :  { %553 = vmatpush3.msra.mxu1 %v334_v21 }
 0x192   :  { %v474_v13 = vpop.f32.mrf.mxu1 }
 0x194   :  { %v475_v15 = vpop.f32.mrf.mxu1 }
 0x195   :  { %v476_v16 = vadd.f32 %v475_v15, %v474_v13 }
 0x197   :  { %v236_v17 = vadd.f32 %v476_v16, %v438_v14 }
 0x199   :  { %v239_v18 = vmax.f32 %v236_v17, 0.0 }
 0x19b   :  { %536 = vmatmul.mubr.f32.vlgmr.msra.gmra.mxu0 %v239_v18 }
 0x25b   :  { %v329_v23 = vpop.f32.mrf.mxu0 }
 0x25c   :  { %v330_v24 = vadd.f32 %v439_v22, %v329_v23 }
 0x25d   :  { %v537_v25 = vpop.f32.mrf.mxu0 }
 0x25e   :  { %v333_v26 = vmax.f32 %v330_v24, 0.0 }
 0x260   :  { %555 = vmatmul.mubr.msk.f32.vlgmr.msra.gmra.mxu1 %vm349_vm2, %v333_v26 }
 0x320   :  { %v419_v3 = vpop.f32.mrf.mxu1 }
 0x321   :  { %v420_v28 = vadd.f32 %v440_v27, %v419_v3 }
 0x322   :  { %v556_v29 = vpop.f32.mrf.mxu1 }
 0x323   :  { %423 = vmax.xlane.f32.xlu0 %v420_v28 }
 0x3ac   :  { %v424_v30 = vpop.xlane.xlu0 %423 }
 0x3ad   :  { %v425_v31 = vsub.f32 %v420_v28, %v424_v30 }
 0x3af   :  { %v426_v32 = vmul.f32 1.442695, %v425_v31 }
 0x3b1   :  { %559 = vpow2.f32 %v426_v32 }
 0x3be   :  { %v560_v33 = vpop.eup %559 }
 0x3bf   :  { %428 = vadd.xlane.f32.xlu0 %v560_v33 }
 0x448   :  { %v429_v34 = vpop.xlane.xlu0 %428 }
 0x449   :  { %561 = vrcp.f32 %v429_v34 }
 0x456   :  { %v562_v35 = vpop.eup %561 }
 0x457   :  { %v431_v36 = vmul.f32 %v562_v35, %v560_v33 }
 0x459   :  { %432 = vst [vmem:[%s861_s9] sm:$0xff] %v431_v36 }

</bundles_post_ra>
